<compile_context>
chip_gen: v6e
topology: v6e:2x2x1
jax: 0.10.0
libtpu: 0.0.40
codegen_flags: <defaults>
</compile_context>

<pallas_src>
import functools

import jax
import jax.numpy as jnp
from jax import lax
from jax.experimental import pallas as pl
from jax.experimental.pallas import tpu as pltpu

EPS = 1e-5  # PyTorch InstanceNorm2d default


def _instance_norm(a, hw):
    """Per-channel InstanceNorm2d(affine=False) over the lane (H*W) axis."""
    inv_hw = 1.0 / hw
    mean = jnp.sum(a, axis=1, keepdims=True) * inv_hw
    var = jnp.sum(a * a, axis=1, keepdims=True) * inv_hw - mean * mean
    var = jnp.maximum(var, 0.0)
    return (a - mean) * lax.rsqrt(var + EPS)


def _resnet_block_kernel(p1_ref, w1_ref, w2_ref, x_ref, o_ref, vbuf, pbuf,
                         *, H, W):
    """Fused ResnetBlock forward for one batch image.

    p1_ref: (1, 9C, HW) stage-1 im2col patches (lane-dense)
    w1_ref: (C, 9C)     stage-1 flattened weights (tap-major, channel-minor)
    w2_ref: (C, 9C)     stage-2 flattened weights
    x_ref:  (1, C, HW)  residual input (lane-dense)
    o_ref:  (1, C, HW)  output (lane-dense)
    vbuf:   (C, HW+2W+2) VMEM scratch: vertically reflection-extended y1
    pbuf:   (9C, HW)     VMEM scratch: stage-2 im2col patches
    """
    C = o_ref.shape[1]
    HW = H * W

    # ---------------- Stage 1: conv (K=36 matmul) + InstanceNorm + ReLU ----
    acc1 = jnp.dot(w1_ref[...], p1_ref[0],
                   preferred_element_type=jnp.float32)           # (C, HW)
    y1 = jnp.maximum(_instance_norm(acc1, HW), 0.0)

    # -------- Stage 2: in-kernel ReflectionPad2d(1) + im2col + conv --------
    # vbuf lane layout: [1 pad | W lanes = row 1 (top reflection) | HW lanes =
    #                    y1 | W lanes = row H-2 (bottom reflection) | 1 pad]
    vbuf[:, pl.ds(1 + W, HW)] = y1
    vbuf[:, pl.ds(1, W)] = y1[:, W:2 * W]                    # reflect row -1 -> row 1
    vbuf[:, pl.ds(1 + W + HW, W)] = y1[:, HW - 2 * W:HW - W]  # reflect row H -> row H-2
    vbuf[:, 0:1] = y1[:, 0:1]                                 # corner filler (masked)
    vbuf[:, pl.ds(2 + 2 * W + HW - 1, 1)] = y1[:, HW - 1:HW]  # corner filler (masked)

    col = lax.broadcasted_iota(jnp.int32, (C, HW), 1) % W
    left_edge = col == 0
    right_edge = col == (W - 1)

    # Tap (dy, dx): vbuf[:, dy*W + dx : ... + HW] is the vertically reflected,
    # horizontally shifted image; the first/last column of each row is fixed
    # up with a select to implement the horizontal reflection.
    for dy in range(3):
        base = dy * W
        s0 = vbuf[:, pl.ds(base + 0, HW)]
        s1 = vbuf[:, pl.ds(base + 1, HW)]
        s2 = vbuf[:, pl.ds(base + 2, HW)]
        taps = (jnp.where(left_edge, s2, s0),      # dx = 0
                s1,                                # dx = 1
                jnp.where(right_edge, s0, s2))     # dx = 2
        for dx in range(3):
            k = dy * 3 + dx
            pbuf[pl.ds(k * C, C), :] = taps[dx]

    acc2 = jnp.dot(w2_ref[...], pbuf[...],
                   preferred_element_type=jnp.float32)           # (C, HW)
    y2 = _instance_norm(acc2, HW)

    # ---------------- Residual add + lane-dense store ----------------------
    o_ref[0] = (y2 + x_ref[0]).astype(o_ref.dtype)


def _w_flat(w):
    # (C_out, C_in, 3, 3) -> (C_out, 9*C_in), contraction index = tap*C_in + ci
    return jnp.transpose(w, (0, 2, 3, 1)).reshape(w.shape[0], 9 * w.shape[1])


def resnet_block_forward(x, params, dilation=1):
    """x: (N, C, H, W) float32.  Returns x + conv_block(x)."""
    w1, b1, w2, b2 = params
    # Bias before InstanceNorm(affine=False) is a mathematical no-op
    # (mean subtraction cancels it), so b1/b2 are intentionally unused.
    del b1, b2
    N, C, H, W = x.shape
    HW = H * W
    d = dilation

    # Stage-1 ReflectionPad(dilation) + im2col in the wrapper (layout plumbing).
    xp = jnp.pad(x, ((0, 0), (0, 0), (d, d), (d, d)), mode="reflect")
    taps = [xp[:, :, ky * d:ky * d + H, kx * d:kx * d + W].reshape(N, C, HW)
            for ky in range(3) for kx in range(3)]
    patches1 = jnp.stack(taps, axis=1).reshape(N, 9 * C, HW)

    w1f = _w_flat(w1)
    w2f = _w_flat(w2)
    x_flat = x.reshape(N, C, HW)

    kernel = functools.partial(_resnet_block_kernel, H=H, W=W)
    out = pl.pallas_call(
        kernel,
        out_shape=jax.ShapeDtypeStruct((N, C, HW), jnp.float32),
        grid_spec=pltpu.PrefetchScalarGridSpec(
            num_scalar_prefetch=0,
            grid=(N,),
            in_specs=[
                pl.BlockSpec((1, 9 * C, HW), lambda n: (n, 0, 0)),
                pl.BlockSpec((C, 9 * C), lambda n: (0, 0)),
                pl.BlockSpec((C, 9 * C), lambda n: (0, 0)),
                pl.BlockSpec((1, C, HW), lambda n: (n, 0, 0)),
            ],
            out_specs=pl.BlockSpec((1, C, HW), lambda n: (n, 0, 0)),
            scratch_shapes=[
                pltpu.VMEM((C, HW + 2 * W + 2), jnp.float32),   # vbuf
                pltpu.VMEM((9 * C, HW), jnp.float32),           # pbuf
            ],
        ),
        compiler_params=pltpu.CompilerParams(
            dimension_semantics=("parallel",)),
    )(patches1, w1f, w2f, x_flat)

    return out.reshape(N, C, H, W)


def resnet_block_reference(x, params, dilation=1):
    """Pure-JAX reference (includes the bias, to validate the no-op claim)."""
    w1, b1, w2, b2 = params

    def conv(xin, w, b, dil):
        xp = jnp.pad(xin, ((0, 0), (0, 0), (dil, dil), (dil, dil)),
                     mode="reflect")
        y = lax.conv_general_dilated(
            xp, w, window_strides=(1, 1), padding="VALID",
            rhs_dilation=(dil, dil),
            dimension_numbers=("NCHW", "OIHW", "NCHW"))
        return y + b[None, :, None, None]

    def inorm(y):
        m = jnp.mean(y, axis=(2, 3), keepdims=True)
        v = jnp.mean((y - m) ** 2, axis=(2, 3), keepdims=True)
        return (y - m) * lax.rsqrt(v + EPS)

    h = jnp.maximum(inorm(conv(x, w1, b1, dilation)), 0.0)
    h = inorm(conv(h, w2, b2, 1))
    return x + h


if __name__ == "__main__":
    N, C, H, W = 2, 4, 16, 16  # batch=2, dim=4, spatial=16
    dilation = 1

    key = jax.random.PRNGKey(0)
    k_x, k_w1, k_b1, k_w2, k_b2 = jax.random.split(key, 5)

    x = jax.random.normal(k_x, (N, C, H, W), jnp.float32)
    # Conv2d(dim, dim, kernel_size=3) parameter shapes, deterministic init.
    w1 = jax.random.normal(k_w1, (C, C, 3, 3), jnp.float32) * 0.1
    b1 = jax.random.normal(k_b1, (C,), jnp.float32) * 0.1
    w2 = jax.random.normal(k_w2, (C, C, 3, 3), jnp.float32) * 0.1
    b2 = jax.random.normal(k_b2, (C,), jnp.float32) * 0.1
    params = (w1, b1, w2, b2)

    out = jax.block_until_ready(resnet_block_forward(x, params, dilation))
    ref = jax.block_until_ready(resnet_block_reference(x, params, dilation))

    assert out.shape == (N, C, H, W)
    assert jnp.allclose(out, ref, atol=1e-4, rtol=1e-4), (
        float(jnp.max(jnp.abs(out - ref))))

    print("KERNEL_OK")
</pallas_src>

<mosaic_0001>
module attributes {stable_mosaic.version = 11 : i64} {
  func.func @_resnet_block_kernel(%arg0: i32, %arg1: memref<1x36x256xf32, #tpu.memory_space<vmem>>, %arg2: memref<4x36xf32, #tpu.memory_space<vmem>>, %arg3: memref<4x36xf32, #tpu.memory_space<vmem>>, %arg4: memref<1x4x256xf32, #tpu.memory_space<vmem>>, %arg5: memref<1x4x256xf32, #tpu.memory_space<vmem>>, %arg6: memref<4x290xf32, #tpu.memory_space<vmem>>, %arg7: memref<36x256xf32, #tpu.memory_space<vmem>>) attributes {dimension_semantics = [#tpu.dimension_semantics<parallel>], iteration_bounds = array<i64: 2>, scalar_prefetch = 0 : i64, scratch_operands = 2 : i64, tpu.core_type = #tpu.core_type<tc>, window_params = [{transform_indices = @transform_0, window_bounds = array<i64: 1, 36, 256>}, {pipeline_mode = #tpu.pipeline_mode<synchronous>, transform_indices = @transform_1, window_bounds = array<i64: 4, 36>}, {pipeline_mode = #tpu.pipeline_mode<synchronous>, transform_indices = @transform_2, window_bounds = array<i64: 4, 36>}, {transform_indices = @transform_3, window_bounds = array<i64: 1, 4, 256>}, {transform_indices = @transform_4, window_bounds = array<i64: 1, 4, 256>}]} {
    %c0 = arith.constant 0 : index
    %c0_0 = arith.constant 0 : index
    %0 = vector.load %arg2[%c0, %c0_0] : memref<4x36xf32, #tpu.memory_space<vmem>>, vector<4x36xf32>
    %c0_1 = arith.constant 0 : index
    %c0_2 = arith.constant 0 : index
    %c0_3 = arith.constant 0 : index
    %1 = vector.load %arg1[%c0_1, %c0_2, %c0_3] : memref<1x36x256xf32, #tpu.memory_space<vmem>>, vector<1x36x256xf32>
    %2 = vector.shape_cast %1 : vector<1x36x256xf32> to vector<36x256xf32>
    %cst = arith.constant dense<0.000000e+00> : vector<4x256xf32>
    %3 = tpu.matmul %0, %2, %cst {dimension_numbers = #tpu.dot_dimension_numbers<[1], [0], [0], [1], [0, 0, 1, 1], [], []>} : vector<4x36xf32>, vector<36x256xf32>, vector<4x256xf32> -> vector<4x256xf32>
    %cst_4 = arith.constant dense<0.000000e+00> : vector<4xf32>
    %4 = vector.multi_reduction <add>, %3, %cst_4 [1] : vector<4x256xf32> to vector<4xf32>
    %5 = vector.shape_cast %4 : vector<4xf32> to vector<4x1xf32>
    %cst_5 = arith.constant 3.906250e-03 : f32
    %6 = vector.broadcast %cst_5 : f32 to vector<4x1xf32>
    %7 = arith.mulf %5, %6 : vector<4x1xf32>
    %8 = arith.mulf %3, %3 : vector<4x256xf32>
    %cst_6 = arith.constant dense<0.000000e+00> : vector<4xf32>
    %9 = vector.multi_reduction <add>, %8, %cst_6 [1] : vector<4x256xf32> to vector<4xf32>
    %10 = vector.shape_cast %9 : vector<4xf32> to vector<4x1xf32>
    %cst_7 = arith.constant 3.906250e-03 : f32
    %11 = vector.broadcast %cst_7 : f32 to vector<4x1xf32>
    %12 = arith.mulf %10, %11 : vector<4x1xf32>
    %13 = arith.mulf %7, %7 : vector<4x1xf32>
    %14 = arith.subf %12, %13 : vector<4x1xf32>
    %cst_8 = arith.constant 0.000000e+00 : f32
    %15 = vector.broadcast %cst_8 : f32 to vector<4x1xf32>
    %16 = arith.maximumf %14, %15 : vector<4x1xf32>
    %17 = vector.broadcast %7 : vector<4x1xf32> to vector<4x256xf32>
    %18 = arith.subf %3, %17 : vector<4x256xf32>
    %cst_9 = arith.constant 9.99999974E-6 : f32
    %19 = vector.broadcast %cst_9 : f32 to vector<4x1xf32>
    %20 = arith.addf %16, %19 : vector<4x1xf32>
    %21 = math.rsqrt %20 : vector<4x1xf32>
    %22 = vector.broadcast %21 : vector<4x1xf32> to vector<4x256xf32>
    %23 = arith.mulf %18, %22 : vector<4x256xf32>
    %cst_10 = arith.constant 0.000000e+00 : f32
    %24 = vector.broadcast %cst_10 : f32 to vector<4x256xf32>
    %25 = arith.maximumf %23, %24 : vector<4x256xf32>
    %c0_11 = arith.constant 0 : index
    %c17 = arith.constant 17 : index
    %26 = vector.load %arg6[%c0_11, %c17] : memref<4x290xf32, #tpu.memory_space<vmem>>, vector<4x256xf32>
    tpu.vector_store %arg6[%c0_11, %c17], %25 {strides = array<i32>} : memref<4x290xf32, #tpu.memory_space<vmem>>, vector<4x256xf32>,
    %27 = vector.extract_strided_slice %25 {offsets = [0, 16], sizes = [4, 16], strides = [1, 1]} : vector<4x256xf32> to vector<4x16xf32>
    %c0_12 = arith.constant 0 : index
    %c1 = arith.constant 1 : index
    %28 = vector.load %arg6[%c0_12, %c1] : memref<4x290xf32, #tpu.memory_space<vmem>>, vector<4x16xf32>
    tpu.vector_store %arg6[%c0_12, %c1], %27 {strides = array<i32>} : memref<4x290xf32, #tpu.memory_space<vmem>>, vector<4x16xf32>,
    %29 = vector.extract_strided_slice %25 {offsets = [0, 224], sizes = [4, 16], strides = [1, 1]} : vector<4x256xf32> to vector<4x16xf32>
    %c0_13 = arith.constant 0 : index
    %c273 = arith.constant 273 : index
    %30 = vector.load %arg6[%c0_13, %c273] : memref<4x290xf32, #tpu.memory_space<vmem>>, vector<4x16xf32>
    tpu.vector_store %arg6[%c0_13, %c273], %29 {strides = array<i32>} : memref<4x290xf32, #tpu.memory_space<vmem>>, vector<4x16xf32>,
    %31 = vector.extract_strided_slice %25 {offsets = [0, 0], sizes = [4, 1], strides = [1, 1]} : vector<4x256xf32> to vector<4x1xf32>
    %c0_14 = arith.constant 0 : index
    %c0_15 = arith.constant 0 : index
    %32 = vector.load %arg6[%c0_14, %c0_15] : memref<4x290xf32, #tpu.memory_space<vmem>>, vector<4x1xf32>
    tpu.vector_store %arg6[%c0_14, %c0_15], %31 {strides = array<i32>} : memref<4x290xf32, #tpu.memory_space<vmem>>, vector<4x1xf32>,
    %33 = vector.extract_strided_slice %25 {offsets = [0, 255], sizes = [4, 1], strides = [1, 1]} : vector<4x256xf32> to vector<4x1xf32>
    %c0_16 = arith.constant 0 : index
    %c289 = arith.constant 289 : index
    %34 = vector.load %arg6[%c0_16, %c289] : memref<4x290xf32, #tpu.memory_space<vmem>>, vector<4x1xf32>
    tpu.vector_store %arg6[%c0_16, %c289], %33 {strides = array<i32>} : memref<4x290xf32, #tpu.memory_space<vmem>>, vector<4x1xf32>,
    %35 = tpu.iota {dimensions = array<i32: 1>} : vector<4x256xi32>
    %c16_i32 = arith.constant 16 : i32
    %c0_i32 = arith.constant 0 : i32
    %36 = arith.cmpi eq, %c16_i32, %c0_i32 : i32
    %c1_i32 = arith.constant 1 : i32
    %37 = arith.select %36, %c1_i32, %c16_i32 : i32
    %38 = vector.broadcast %37 : i32 to vector<4x256xi32>
    %39 = arith.remsi %35, %38 : vector<4x256xi32>
    %c0_i32_17 = arith.constant 0 : i32
    %40 = vector.broadcast %c0_i32_17 : i32 to vector<4x256xi32>
    %41 = arith.cmpi ne, %39, %40 : vector<4x256xi32>
    %c0_i32_18 = arith.constant 0 : i32
    %42 = vector.broadcast %c0_i32_18 : i32 to vector<4x256xi32>
    %43 = arith.cmpi slt, %39, %42 : vector<4x256xi32>
    %c0_i32_19 = arith.constant 0 : i32
    %44 = arith.cmpi slt, %37, %c0_i32_19 : i32
    %45 = vector.broadcast %44 : i1 to vector<4x256xi1>
    %46 = vector.broadcast %45 : vector<4x256xi1> to vector<4x256xi1>
    %47 = arith.xori %43, %46 : vector<4x256xi1>
    %48 = arith.andi %47, %41 : vector<4x256xi1>
    %49 = vector.broadcast %37 : i32 to vector<4x256xi32>
    %50 = arith.addi %39, %49 : vector<4x256xi32>
    %51 = arith.select %48, %50, %39 : vector<4x256xi1>, vector<4x256xi32>
    %c0_i32_20 = arith.constant 0 : i32
    %52 = vector.broadcast %c0_i32_20 : i32 to vector<4x256xi32>
    %53 = arith.cmpi eq, %51, %52 : vector<4x256xi32>
    %c15_i32 = arith.constant 15 : i32
    %54 = vector.broadcast %c15_i32 : i32 to vector<4x256xi32>
    %55 = arith.cmpi eq, %51, %54 : vector<4x256xi32>
    %c0_21 = arith.constant 0 : index
    %c0_22 = arith.constant 0 : index
    %56 = vector.load %arg6[%c0_21, %c0_22] : memref<4x290xf32, #tpu.memory_space<vmem>>, vector<4x256xf32>
    %c0_23 = arith.constant 0 : index
    %c1_24 = arith.constant 1 : index
    %57 = vector.load %arg6[%c0_23, %c1_24] : memref<4x290xf32, #tpu.memory_space<vmem>>, vector<4x256xf32>
    %c0_25 = arith.constant 0 : index
    %c2 = arith.constant 2 : index
    %58 = vector.load %arg6[%c0_25, %c2] : memref<4x290xf32, #tpu.memory_space<vmem>>, vector<4x256xf32>
    %59 = arith.select %53, %58, %56 : vector<4x256xi1>, vector<4x256xf32>
    %60 = arith.select %55, %56, %58 : vector<4x256xi1>, vector<4x256xf32>
    %c0_26 = arith.constant 0 : index
    %c0_27 = arith.constant 0 : index
    %61 = vector.load %arg7[%c0_26, %c0_27] : memref<36x256xf32, #tpu.memory_space<vmem>>, vector<4x256xf32>
    tpu.vector_store %arg7[%c0_26, %c0_27], %59 {strides = array<i32>} : memref<36x256xf32, #tpu.memory_space<vmem>>, vector<4x256xf32>,
    %c4 = arith.constant 4 : index
    %c0_28 = arith.constant 0 : index
    %62 = vector.load %arg7[%c4, %c0_28] : memref<36x256xf32, #tpu.memory_space<vmem>>, vector<4x256xf32>
    tpu.vector_store %arg7[%c4, %c0_28], %57 {strides = array<i32>} : memref<36x256xf32, #tpu.memory_space<vmem>>, vector<4x256xf32>,
    %c8 = arith.constant 8 : index
    %c0_29 = arith.constant 0 : index
    %63 = vector.load %arg7[%c8, %c0_29] : memref<36x256xf32, #tpu.memory_space<vmem>>, vector<4x256xf32>
    tpu.vector_store %arg7[%c8, %c0_29], %60 {strides = array<i32>} : memref<36x256xf32, #tpu.memory_space<vmem>>, vector<4x256xf32>,
    %c0_30 = arith.constant 0 : index
    %c16 = arith.constant 16 : index
    %64 = vector.load %arg6[%c0_30, %c16] : memref<4x290xf32, #tpu.memory_space<vmem>>, vector<4x256xf32>
    %c0_31 = arith.constant 0 : index
    %c17_32 = arith.constant 17 : index
    %65 = vector.load %arg6[%c0_31, %c17_32] : memref<4x290xf32, #tpu.memory_space<vmem>>, vector<4x256xf32>
    %c0_33 = arith.constant 0 : index
    %c18 = arith.constant 18 : index
    %66 = vector.load %arg6[%c0_33, %c18] : memref<4x290xf32, #tpu.memory_space<vmem>>, vector<4x256xf32>
    %67 = arith.select %53, %66, %64 : vector<4x256xi1>, vector<4x256xf32>
    %68 = arith.select %55, %64, %66 : vector<4x256xi1>, vector<4x256xf32>
    %c12 = arith.constant 12 : index
    %c0_34 = arith.constant 0 : index
    %69 = vector.load %arg7[%c12, %c0_34] : memref<36x256xf32, #tpu.memory_space<vmem>>, vector<4x256xf32>
    tpu.vector_store %arg7[%c12, %c0_34], %67 {strides = array<i32>} : memref<36x256xf32, #tpu.memory_space<vmem>>, vector<4x256xf32>,
    %c16_35 = arith.constant 16 : index
    %c0_36 = arith.constant 0 : index
    %70 = vector.load %arg7[%c16_35, %c0_36] : memref<36x256xf32, #tpu.memory_space<vmem>>, vector<4x256xf32>
    tpu.vector_store %arg7[%c16_35, %c0_36], %65 {strides = array<i32>} : memref<36x256xf32, #tpu.memory_space<vmem>>, vector<4x256xf32>,
    %c20 = arith.constant 20 : index
    %c0_37 = arith.constant 0 : index
    %71 = vector.load %arg7[%c20, %c0_37] : memref<36x256xf32, #tpu.memory_space<vmem>>, vector<4x256xf32>
    tpu.vector_store %arg7[%c20, %c0_37], %68 {strides = array<i32>} : memref<36x256xf32, #tpu.memory_space<vmem>>, vector<4x256xf32>,
    %c0_38 = arith.constant 0 : index
    %c32 = arith.constant 32 : index
    %72 = vector.load %arg6[%c0_38, %c32] : memref<4x290xf32, #tpu.memory_space<vmem>>, vector<4x256xf32>
    %c0_39 = arith.constant 0 : index
    %c33 = arith.constant 33 : index
    %73 = vector.load %arg6[%c0_39, %c33] : memref<4x290xf32, #tpu.memory_space<vmem>>, vector<4x256xf32>
    %c0_40 = arith.constant 0 : index
    %c34 = arith.constant 34 : index
    %74 = vector.load %arg6[%c0_40, %c34] : memref<4x290xf32, #tpu.memory_space<vmem>>, vector<4x256xf32>
    %75 = arith.select %53, %74, %72 : vector<4x256xi1>, vector<4x256xf32>
    %76 = arith.select %55, %72, %74 : vector<4x256xi1>, vector<4x256xf32>
    %c24 = arith.constant 24 : index
    %c0_41 = arith.constant 0 : index
    %77 = vector.load %arg7[%c24, %c0_41] : memref<36x256xf32, #tpu.memory_space<vmem>>, vector<4x256xf32>
    tpu.vector_store %arg7[%c24, %c0_41], %75 {strides = array<i32>} : memref<36x256xf32, #tpu.memory_space<vmem>>, vector<4x256xf32>,
    %c28 = arith.constant 28 : index
    %c0_42 = arith.constant 0 : index
    %78 = vector.load %arg7[%c28, %c0_42] : memref<36x256xf32, #tpu.memory_space<vmem>>, vector<4x256xf32>
    tpu.vector_store %arg7[%c28, %c0_42], %73 {strides = array<i32>} : memref<36x256xf32, #tpu.memory_space<vmem>>, vector<4x256xf32>,
    %c32_43 = arith.constant 32 : index
    %c0_44 = arith.constant 0 : index
    %79 = vector.load %arg7[%c32_43, %c0_44] : memref<36x256xf32, #tpu.memory_space<vmem>>, vector<4x256xf32>
    tpu.vector_store %arg7[%c32_43, %c0_44], %76 {strides = array<i32>} : memref<36x256xf32, #tpu.memory_space<vmem>>, vector<4x256xf32>,
    %c0_45 = arith.constant 0 : index
    %c0_46 = arith.constant 0 : index
    %80 = vector.load %arg3[%c0_45, %c0_46] : memref<4x36xf32, #tpu.memory_space<vmem>>, vector<4x36xf32>
    %c0_47 = arith.constant 0 : index
    %c0_48 = arith.constant 0 : index
    %81 = vector.load %arg7[%c0_47, %c0_48] : memref<36x256xf32, #tpu.memory_space<vmem>>, vector<36x256xf32>
    %cst_49 = arith.constant dense<0.000000e+00> : vector<4x256xf32>
    %82 = tpu.matmul %80, %81, %cst_49 {dimension_numbers = #tpu.dot_dimension_numbers<[1], [0], [0], [1], [0, 0, 1, 1], [], []>} : vector<4x36xf32>, vector<36x256xf32>, vector<4x256xf32> -> vector<4x256xf32>
    %cst_50 = arith.constant dense<0.000000e+00> : vector<4xf32>
    %83 = vector.multi_reduction <add>, %82, %cst_50 [1] : vector<4x256xf32> to vector<4xf32>
    %84 = vector.shape_cast %83 : vector<4xf32> to vector<4x1xf32>
    %cst_51 = arith.constant 3.906250e-03 : f32
    %85 = vector.broadcast %cst_51 : f32 to vector<4x1xf32>
    %86 = arith.mulf %84, %85 : vector<4x1xf32>
    %87 = arith.mulf %82, %82 : vector<4x256xf32>
    %cst_52 = arith.constant dense<0.000000e+00> : vector<4xf32>
    %88 = vector.multi_reduction <add>, %87, %cst_52 [1] : vector<4x256xf32> to vector<4xf32>
    %89 = vector.shape_cast %88 : vector<4xf32> to vector<4x1xf32>
    %cst_53 = arith.constant 3.906250e-03 : f32
    %90 = vector.broadcast %cst_53 : f32 to vector<4x1xf32>
    %91 = arith.mulf %89, %90 : vector<4x1xf32>
    %92 = arith.mulf %86, %86 : vector<4x1xf32>
    %93 = arith.subf %91, %92 : vector<4x1xf32>
    %cst_54 = arith.constant 0.000000e+00 : f32
    %94 = vector.broadcast %cst_54 : f32 to vector<4x1xf32>
    %95 = arith.maximumf %93, %94 : vector<4x1xf32>
    %96 = vector.broadcast %86 : vector<4x1xf32> to vector<4x256xf32>
    %97 = arith.subf %82, %96 : vector<4x256xf32>
    %cst_55 = arith.constant 9.99999974E-6 : f32
    %98 = vector.broadcast %cst_55 : f32 to vector<4x1xf32>
    %99 = arith.addf %95, %98 : vector<4x1xf32>
    %100 = math.rsqrt %99 : vector<4x1xf32>
    %101 = vector.broadcast %100 : vector<4x1xf32> to vector<4x256xf32>
    %102 = arith.mulf %97, %101 : vector<4x256xf32>
    %c0_56 = arith.constant 0 : index
    %c0_57 = arith.constant 0 : index
    %c0_58 = arith.constant 0 : index
    %103 = vector.load %arg4[%c0_56, %c0_57, %c0_58] : memref<1x4x256xf32, #tpu.memory_space<vmem>>, vector<1x4x256xf32>
    %104 = vector.shape_cast %103 : vector<1x4x256xf32> to vector<4x256xf32>
    %105 = arith.addf %102, %104 : vector<4x256xf32>
    %c0_59 = arith.constant 0 : index
    %c0_60 = arith.constant 0 : index
    %c0_61 = arith.constant 0 : index
    %106 = vector.load %arg5[%c0_59, %c0_60, %c0_61] : memref<1x4x256xf32, #tpu.memory_space<vmem>>, vector<1x4x256xf32>
    %107 = vector.shape_cast %106 : vector<1x4x256xf32> to vector<4x256xf32>
    %108 = vector.shape_cast %105 : vector<4x256xf32> to vector<1x4x256xf32>
    tpu.vector_store %arg5[%c0_59, %c0_60, %c0_61], %108 {strides = array<i32>} : memref<1x4x256xf32, #tpu.memory_space<vmem>>, vector<1x4x256xf32>,
    return
  }
  func.func @transform_0(%arg0: i32) -> (i32, i32, i32) {
    %c0_i32 = arith.constant 0 : i32
    %c0_i32_0 = arith.constant 0 : i32
    %c0_i32_1 = arith.constant 0 : i32
    return %arg0, %c0_i32, %c0_i32_0 : i32, i32, i32
  }
  func.func @transform_1(%arg0: i32) -> (i32, i32) {
    %c0_i32 = arith.constant 0 : i32
    %c0_i32_0 = arith.constant 0 : i32
    %c0_i32_1 = arith.constant 0 : i32
    return %c0_i32, %c0_i32_0 : i32, i32
  }
  func.func @transform_2(%arg0: i32) -> (i32, i32) {
    %c0_i32 = arith.constant 0 : i32
    %c0_i32_0 = arith.constant 0 : i32
    %c0_i32_1 = arith.constant 0 : i32
    return %c0_i32, %c0_i32_0 : i32, i32
  }
  func.func @transform_3(%arg0: i32) -> (i32, i32, i32) {
    %c0_i32 = arith.constant 0 : i32
    %c0_i32_0 = arith.constant 0 : i32
    %c0_i32_1 = arith.constant 0 : i32
    return %arg0, %c0_i32, %c0_i32_0 : i32, i32, i32
  }
  func.func @transform_4(%arg0: i32) -> (i32, i32, i32) {
    %c0_i32 = arith.constant 0 : i32
    %c0_i32_0 = arith.constant 0 : i32
    %c0_i32_1 = arith.constant 0 : i32
    return %arg0, %c0_i32, %c0_i32_0 : i32, i32, i32
  }
}

</mosaic_0001>

<bundles_post_ra>
// kernel: tpu_custom_call.1
= control target key start
LH: loop header
LB: loop body
LE: loop exit
PB: predicated region body
PF: predicated region fallthrough
CT: control target
= control target key end

     0   :  { %9 = vsyncpa [#allocation5], 0  ;;  %s1136_s0 = inlined_call_operand.vmem [shape: f32[2,36,256], index: 0, kind: input, shape index: {}]   ;;  %s1137_s1 = inlined_call_operand.vmem [shape: f32[4,36], index: 1, kind: input, shape index: {}]   ;;  %s1138_s2 = inlined_call_operand.vmem [shape: f32[4,36], index: 2, kind: input, shape index: {}]   ;;  %s1139_s3 = inlined_call_operand.vmem [shape: f32[2,4,256], index: 3, kind: input, shape index: {}]   ;;  %s1140_s4 = inlined_call_operand.hbm [shape: f32[2,4,256], index: 4, kind: output, shape index: {}]  }
   0x1   :  { %11 = vsyncpa [#allocation5 + $0x1], 0  ;;  %s943_s15 = smov 0   ;;  %s945_s16 = smov 0  }
   0x2   :  { %s947_s17 = smov 0   ;;  %s949_s18 = smov 0  }
   0x3 LB: > { %s964_s19 = sadd.s32 4294967295, %s902_s18   ;;  %s759_s20 = sadd.s32 4294967294, %s902_s18   ;;  %s902_s18 = sphi %s949_s18, %s1154_s18   ;;  %s898_s17 = sphi %s947_s17, %s1153_s17   ;;  %s894_s16 = sphi %s945_s16, %s1152_s16   ;;  %s890_s15 = sphi %s943_s15, %s1151_s15  }
   0x4   : > { %s968_s21 = sadd.s32 1, %s902_s18   ;;  %s118_s22 = sadd.s32 1, %s898_s17 }
   0x5   : > { %s115_s23 = ssub.s32 %s902_s18, %s968_s21  ;;  %p128_p0 = scmp.ne.s32.totalorder %s898_s17, %s894_s16 }
   0x6   : > { %p116_p1 = scmp.eq.s32.totalorder %s115_s23, 0  ;;  %p129_p2 = scmp.eq.s32.totalorder %s964_s19, 1 }
   0x7   : > { %p134_p3 = scmp.ne.s32.totalorder %s894_s16, %s890_s15  ;;  %p135_p4 = scmp.eq.s32.totalorder %s759_s20, 1 }
   0x8   : > { %s979_s24 = scalar_select %p116_p1, %s898_s17, %s118_s22  }
   0x9   : > { %p981_p5 = por %p129_p2, %p128_p0  ;;  %p985_p6 = por %p135_p4, %p134_p3 }
   0xa   : > { %p762_p7 = scmp.ge.s32.totalorder %s902_s18, 1  ;;  %p175_p8 = scmp.lt.s32.totalorder %s902_s18, 3 }
   0xc   : > { %p176_p9 = pnand %p762_p7, %p175_p8 }
   0xd   : > { %p206_p10 = scmp.lt.s32.totalorder (!%p176_p9), %s964_s19, 1  ;;  %s905_s8 = smov (!%p176_p9), 49  }
   0xe   : > { %179 = sbr.rel (%p176_p9) target bundleno = 1091 (0x443), region = 36  ;;  %s906_s9 = smov (!%p176_p9), 17  }
   0xf   : > { %s907_s10 = smov (!%p176_p9), 113   ;;  %s908_s11 = smov (!%p176_p9), 34  }
  0x10   : > { %s909_s12 = smov (!%p176_p9), 94   ;;  %s910_s13 = smov (!%p176_p9), 110  }
  0x11   : > { %s911_s14 = smov (!%p176_p9), 96   ;;  %s912_s20 = smov (!%p176_p9), 112  }
  0x12   : > { %s913_s22 = smov (!%p176_p9), 111   ;;  %s914_s23 = smov (!%p176_p9), 126  }
  0x13   : > { %v904_v0 = vmov 0.0   ;;  %s993_s27 = scalar_select %p206_p10, %s964_s19, 1  ;;  %vm231_vm0 = vcmask 1043456   ;;  %v216_v11 = vld [vmem:[%s1137_s1] sm:$0xf]  ;;  %vm227_vm1 = vcmask 293888   ;;  %v367_v60 = vlaneseq }
  0x14   : > { %302 = vmatprep.mubr.f32.mxu0 %v904_v0  ;;  %632 = vmatprep.mubr.f32.mxu1 %v904_v0  ;;  %vm344_vm2 = vcmask 1043592   ;;  %vm345_vm3 = vcmask 1047556   ;;  %vm340_vm4 = vcmask 138240   ;;  %vm348_vm5 = vcmask 134144   ;;  %s916_s29 = smov 127   ;;  %s203_s7 = sand.u32 1, %s894_s16  }
  0x15   : > { %s780_s28 = smul.u32 80, %s993_s27  ;;  %vm346_vm6 = vmor %vm345_vm3, %vm344_vm2  ;;  %vm358_vm7 = vcmask 265352   ;;  %vm353_vm8 = vcmask 134152   ;;  %vm360_vm9 = vcmask 3072   ;;  %vm365_vm10 = vcmask 273672   ;;  %s778_s6 = sshll.u32 %s993_s27, 3 }
  0x16   : > { %v368_v63 = vand.u32 127, %v367_v60  ;;  %vm539_vm11 = vcmask 777216   ;;  %vm483_vm12 = vcmask 908288   ;;  %vm509_vm13 = vcmask 769024  }
  0x17   : > { %s210_s5 = scalar_lea.vmem %s1136_s0, %s780_s28  ;;  %s915_s28 = smov 95   ;;  %vm409_vm14 = vcmask 1031168   ;;  %vm520_vm15 = vcmask 785408  }
  0x18   : > { %v226_v1 = vld [vmem:[%s210_s5 + $0x48] sm:$0xf]  ;;  %v225_v2 = vld [vmem:[%s210_s5 + $0x40] sm:$0xf]  ;;  %v224_v3 = vld [vmem:[%s210_s5 + $0x38] sm:$0xff] }
  0x19   : > { %767 = vmatprep.subr.msk.mxu0 %vm231_vm0, %v226_v1  ;;  %v223_v4 = vld [vmem:[%s210_s5 + $0x30] sm:$0xff]  ;;  %v222_v5 = vld [vmem:[%s210_s5 + $0x28] sm:$0xff]  ;;  %v221_v6 = vld [vmem:[%s210_s5 + $0x20] sm:$0xff] }
  0x1a   : > { %768 = vmatpush1.msk.msra.mxu0 %vm231_vm0, %v225_v2  ;;  %v220_v7 = vld [vmem:[%s210_s5 + $0x18] sm:$0xff]  ;;  %v219_v8 = vld [vmem:[%s210_s5 + $0x10] sm:$0xff]  ;;  %v218_v9 = vld [vmem:[%s210_s5 + $0x8] sm:$0xff]  ;;  %v369_v2 = vadd.s32 128, %v368_v63 }
  0x1b   : > { %262 = vmatprep.subr.mxu0 %v224_v3  ;;  %v217_v10 = vld [vmem:[%s210_s5] sm:$0xff] }
  0x1c   : > { %263 = vmatpush1.msra.mxu0 %v223_v4 }
  0x1d   : > { %264 = vmatprep.subr.mxu0 %v222_v5 }
  0x1e   : > { %265 = vmatpush1.msra.mxu0 %v221_v6  ;;  %v381_v6 = vand.u32 15, %v369_v2 }
  0x1f   : > { %266 = vmatprep.subr.mxu0 %v220_v7  ;;  %v374_v7 = vand.u32 15, %v368_v63 }
  0x20   : > { %267 = vmatpush1.msra.mxu0 %v219_v8  ;;  %vm1036_vm2 = vcmp.eq.s32.totalorder %v381_v6, 0  ;;  %vm1040_vm3 = vcmp.eq.s32.totalorder %v381_v6, 15 }
  0x21   : > { %268 = vmatprep.subr.mxu0 %v218_v9 }
  0x22   : > { %269 = vmatpush1.msra.mxu0 %v217_v10 }
  0x23   : > { %769 = vmatmul.mubr.msk.f32.vlgmr.msra.gmra.mxu0 %vm227_vm1, %v216_v11 }
  0xe3   : > { %v304_v12 = vpop.f32.mrf.mxu0 }
  0xe4   : > { %v315_v14 = vmul.f32 %v304_v12, %v304_v12  ;;  %v309_v16 = vsel %vm231_vm0, %v304_v12, 0.0 }
  0xe5   : > { %v306_v13 = vpop.f32.mrf.mxu0 }
  0xe6   : > { %v316_v15 = vmul.f32 %v306_v13, %v306_v13  ;;  %v310_v17 = vsel %vm231_vm0, %v306_v13, 0.0  ;;  %v317_v20 = vsel %vm231_vm0, %v315_v14, 0.0 }
  0xe7   : > { %v311_v18 = vadd.f32 %v310_v17, %v309_v16 }
  0xe8   : > { %v318_v19 = vsel %vm231_vm0, %v316_v15, 0.0 }
  0xe9   : > { %312 = vadd.xlane.f32.xlu0 %v311_v18  ;;  %v319_v21 = vadd.f32 %v318_v19, %v317_v20 }
  0xed   : > { %320 = vadd.xlane.f32.xlu0 %v319_v21 }
 0x172   : > { %v313_v22 = vpop.xlane.xlu0 %312 }
 0x173   : > { %v314_v23 = vmul.f32 0.00390625, %v313_v22 }
 0x175   : > { %v323_v25 = vmul.f32 %v314_v23, %v314_v23  ;;  %v326_v30 = vsub.f32 %v304_v12, %v314_v23  ;;  %v327_v31 = vsub.f32 %v306_v13, %v314_v23 }
 0x176   : > { %v321_v24 = vpop.xlane.xlu0 %320 }
 0x177   : > { %v322_v26 = vmul.f32 0.00390625, %v321_v24 }
 0x179   : > { %v324_v27 = vsub.f32 %v322_v26, %v323_v25 }
 0x17b   : > { %v325_v28 = vmax.f32 %v324_v27, 0.0 }
 0x17d   : > { %v328_v29 = vadd.f32 1e-05, %v325_v28 }
 0x17f   : > { %838 = vrsqrt.f32 %v328_v29 }
 0x18c   : > { %v839_v32 = vpop.eup %838 }
 0x18d   : > { %v331_v33 = vmul.f32 %v839_v32, %v327_v31  ;;  %v330_v34 = vmul.f32 %v839_v32, %v326_v30 }
 0x18f   : > { %v333_v35 = vmax.f32 %v331_v33, 0.0  ;;  %v332_v36 = vmax.f32 %v330_v34, 0.0 }
 0x191   : > { %355 = vrot.lane.b32.xlu0 %v333_v35, %s905_s8  ;;  %v336_v37 = vcombine.low %v332_v36, %v333_v35 }
 0x193   : > { %337 = vrot.lane.b32.xlu1 %v336_v37, %s906_s9 }
 0x197   : > { %350 = vrot.lane.b32.xlu1 %v332_v36, %s907_s10  ;;  %s215_s10 = scalar_lea.vmem %s1139_s3, %s778_s6 }
 0x19b   : > { %362 = vrot.lane.b32.xlu1 %v333_v35, %s908_s11  ;;  %s763_s11 = sshll.u32 %s203_s7, 3 }
 0x203   : > { %v356_v40 = vpop.permute.xlu0 %355 }
 0x205   : > { %v338_v38 = vpop.permute.xlu1 %337 }
 0x206   : > { %v339_v39 = vrot.slane %v338_v38, 4 }
 0x208   : > { %v341_v41 = vsel %vm340_vm4, %v339_v39, %v338_v38  ;;  %349 = vst.msk [vmem:[#allocation2 + $0x8] sm:$0xf] %vm348_vm5, %v339_v39  ;;  %vm1044_vm4 = vcmp.eq.s32.totalorder %v374_v7, 0  ;;  %vm1048_vm5 = vcmp.eq.s32.totalorder %v374_v7, 15 }
 0x209   : > { %347 = vst.msk [vmem:[#allocation2] sm:$0xff] %vm346_vm6, %v341_v41  ;;  %v351_v42 = vpop.permute.xlu1 %350  ;;  %vm429_vm6 = vcmask 1039360  }
 0x20a   : > { %359 = vst.msk [vmem:[#allocation2 + $0x8] sm:$0xf] %vm358_vm7, %v356_v40  ;;  %vm449_vm7 = vcmask 900096  }
 0x20b   : > { %354 = vst.msk [vmem:[#allocation2] sm:$0xf] %vm353_vm8, %v351_v42  ;;  %vm460_vm8 = vcmask 916480  }
 0x20c   : > { %361 = vst.msk [vmem:[#allocation2] sm:$0xf] %vm360_vm9, %v332_v36 }
 0x20d   : > { %v363_v43 = vpop.permute.xlu1 %362 }
 0x20e   : > { %366 = vst.msk [vmem:[#allocation2 + $0x8] sm:$0xf] %vm365_vm10, %v363_v43 }
 0x213   : > { %v1010_v46 = vld [vmem:[#allocation2] sm:$0xff] }
 0x214   : > { %v442_v49 = vcombine.high %v1010_v46, %v1010_v46  ;;  %v421_v50 = vcombine.low %v1010_v46, %v1010_v46 }
 0x215   : > { %v499_v44 = vld [vmem:[#allocation2 + $0x8] sm:$0xf] }
 0x216   : > { %v439_v45 = vld [vmem:[#allocation2 + $0x8] sm:$0xf]  ;;  %507 = vrot.lane.b32.xlu1 %v499_v44, %s909_s12  ;;  %v532_v48 = vcombine.low %v499_v44, %v499_v44 }
 0x217   : > { %447 = vrot.lane.b32.xlu0 %v439_v45, %s910_s13  ;;  %v399_v47 = vld [vmem:[#allocation2 + $0x8] sm:$0xf] }
 0x218   : > { %v422_v51 = vcombine.low %v399_v47, %v399_v47 }
 0x21a   : > { %518 = vrot.lane.b32.xlu1 %v499_v44, %s911_s14 }
 0x21b   : > { %458 = vrot.lane.b32.xlu0 %v439_v45, %s912_s20 }
 0x21e   : > { %481 = vrot.lane.b32.xlu1 %v439_v45, %s913_s22 }
 0x21f   : > { %514 = vrot.lane.b32.xlu0 %v1010_v46, %s911_s14 }
 0x222   : > { %407 = vrot.lane.b32.xlu1 %v399_v47, %s914_s23 }
 0x223   : > { %454 = vrot.lane.b32.xlu0 %v1010_v46, %s912_s20 }
 0x226   : > { %503 = vrot.lane.b32.xlu1 %v1010_v46, %s909_s12 }
 0x227   : > { %477 = vrot.lane.b32.xlu0 %v1010_v46, %s913_s22 }
 0x22a   : > { %443 = vrot.lane.b32.xlu1 %v1010_v46, %s910_s13 }
 0x22b   : > { %537 = vrot.lane.b32.xlu0 %v532_v48, %s915_s28 }
 0x22e   : > { %535 = vrot.lane.b32.xlu1 %v1010_v46, %s915_s28 }
 0x22f   : > { %425 = vrot.lane.b32.xlu0 %v1010_v46, %s916_s29 }
 0x232   : > { %505 = vrot.lane.b32.xlu1 %v442_v49, %s909_s12  ;;  %s779_s12 = sshll.u32 %s964_s19, 7 }
 0x233   : > { %479 = vrot.lane.b32.xlu0 %v442_v49, %s913_s22  ;;  %s686_s22 = scalar_lea.hbm %s1140_s4, %s779_s12 }
 0x236   : > { %516 = vrot.lane.b32.xlu1 %v442_v49, %s911_s14 }
 0x237   : > { %405 = vrot.lane.b32.xlu0 %v442_v49, %s914_s23 }
 0x23a   : > { %445 = vrot.lane.b32.xlu1 %v442_v49, %s910_s13  ;;  %s205_s13 = scalar_lea.vmem [#allocation4], %s763_s11 }
 0x23b   : > { %423 = vrot.lane.b32.xlu0 %v421_v50, %s916_s29  ;;  %s688_s14 = sshll.u32 %s205_s13, 4  ;;  %s689_s14 = int_to_ptr.vmem [resolvable:$true] %s688_s14 }
 0x23e   : > { %456 = vrot.lane.b32.xlu1 %v442_v49, %s912_s20 }
 0x242   : > { %533 = vrot.lane.b32.xlu1 %v421_v50, %s915_s28  ;;  %s842_s28 = scalar_lea.vmem %s689_s14, 128 }
 0x243   : > { %p843_p11 = scmp.ne.s32.totalorder %s689_s14, %s842_s28 }
 0x245   : > { %p844_p12 = pnand %p843_p11, %p981_p5 }
 0x246   : > { %403 = vrot.lane.b32.xlu1 %v1010_v46, %s914_s23  ;;  %s674_s23 = scalar_lea.sflag [#allocation5], %s203_s7 }
 0x247   : > { %p845_p13 = pneg %p844_p12 }
 0x24a   : > { %427 = vrot.lane.b32.xlu1 %v422_v51, %s916_s29  ;;  %s917_s29 = smov [#allocation4]  }
 0x24b   : > { %s846_s30 = sshll.u32 %s917_s29, 4  ;;  %s847_s30 = int_to_ptr.vmem [resolvable:$false] %s846_s30 }
 0x24c   : > { %s848_s19 = scalar_lea.vmem %s847_s30, 256  ;;  %p849_p0 = scmp.lt.s32.totalorder %s689_s14, %s847_s30 }
 0x24d   : > { %p850_p1 = scmp.lt.s32.totalorder %s848_s19, %s842_s28 }
 0x24f   : > { %p851_p2 = por %p850_p1, %p849_p0 }
 0x251   : > { %p852_p3 = pnand %p851_p2, %p845_p13 }
 0x288   : > { %v508_v52 = vpop.permute.xlu1 %507 }
 0x289   : > { %v1026_v53 = vpop.permute.xlu0 %447 }
 0x28c   : > { %v519_v54 = vpop.permute.xlu1 %518 }
 0x28d   : > { %v1028_v55 = vpop.permute.xlu0 %458 }
 0x290   : > { %v482_v56 = vpop.permute.xlu1 %481 }
 0x291   : > { %v515_v57 = vpop.permute.xlu0 %514 }
 0x294   : > { %v408_v59 = vpop.permute.xlu1 %407 }
 0x295   : > { %v455_v58 = vpop.permute.xlu0 %454 }
 0x298   : > { %v504_v62 = vpop.permute.xlu1 %503 }
 0x299   : > { %v478_v61 = vpop.permute.xlu0 %477 }
 0x29c   : > { %v444_v1 = vpop.permute.xlu1 %443 }
 0x29d   : > { %v538_v0 = vpop.permute.xlu0 %537 }
 0x2a0   : > { %v1032_v4 = vpop.permute.xlu1 %535 }
 0x2a1   : > { %v1030_v3 = vpop.permute.xlu0 %425  ;;  %v541_v5 = vsel %vm539_vm11, %v1032_v4, %v538_v0 }
 0x2a2   : > { %545 = vst [vmem:[#allocation3 + $0x20] sm:$0xf0] %v541_v5 }
 0x2a4   : > { %v506_v9 = vpop.permute.xlu1 %505 }
 0x2a5   : > { %v480_v8 = vpop.permute.xlu0 %479  ;;  %v510_v15 = vsel %vm509_vm13, %v504_v62, %v506_v9  ;;  %v511_v19 = vsel %vm509_vm13, %v506_v9, %v508_v52 }
 0x2a6   : > { %v484_v10 = vsel %vm483_vm12, %v478_v61, %v480_v8  ;;  %v485_v11 = vsel %vm483_vm12, %v480_v8, %v482_v56 }
 0x2a7   : > { %488 = vst [vmem:[#allocation3 + $0x48] sm:$0xf] %v484_v10  ;;  %489 = vst [vmem:[#allocation3 + $0x28] sm:$0xf] %v485_v11 }
 0x2a8   : > { %v517_v18 = vpop.permute.xlu1 %516 }
 0x2a9   : > { %v406_v16 = vpop.permute.xlu0 %405  ;;  %v521_v21 = vsel %vm520_vm15, %v515_v57, %v517_v18  ;;  %v522_v22 = vsel %vm520_vm15, %v517_v18, %v519_v54  ;;  %v662_v18 = vld [vmem:[%s215_s10] sm:$0xff] }
 0x2aa   : > { %v411_v20 = vsel %vm409_vm14, %v406_v16, %v408_v59  ;;  %v525_v25 = vsel %vm1044_vm4, %v510_v15, %v521_v21  ;;  %v526_v26 = vsel %vm1036_vm2, %v511_v19, %v522_v22  ;;  %v527_v27 = vsel %vm1048_vm5, %v521_v21, %v510_v15 }
 0x2ab   : > { %v416_v23 = vsel %vm1036_vm2, %v411_v20, %v442_v49  ;;  %v418_v24 = vsel %vm1040_vm3, %v442_v49, %v411_v20  ;;  %v528_v28 = vsel %vm1040_vm3, %v522_v22, %v511_v19  ;;  %529 = vst [vmem:[#allocation3 + $0x8] sm:$0xf] %v525_v25  ;;  %530 = vst [vmem:[#allocation3 + $0x20] sm:$0xf] %v526_v26 }
 0x2ac   : > { %420 = vst [vmem:[#allocation3] sm:$0xf] %v416_v23  ;;  %437 = vst [vmem:[#allocation3 + $0x10] sm:$0xf] %v418_v24  ;;  %v446_v30 = vpop.permute.xlu1 %445  ;;  %v664_v21 = vcombine.high %v662_v18, %v662_v18 }
 0x2ad   : > { %546 = vst [vmem:[#allocation3 + $0x40] sm:$0xf] %v527_v27  ;;  %547 = vst [vmem:[#allocation3 + $0x38] sm:$0xf] %v528_v28  ;;  %v424_v29 = vpop.permute.xlu0 %423  ;;  %v450_v33 = vsel %vm449_vm7, %v444_v1, %v446_v30  ;;  %v451_v34 = vsel %vm449_vm7, %v446_v30, %v1026_v53 }
 0x2ae   : > { %v430_v31 = vsel %vm429_vm6, %v424_v29, %v1030_v3 }
 0x2af   : > { %434 = vst [vmem:[#allocation3 + $0x30] sm:$0xf0] %v430_v31 }
 0x2b0   : > { %v457_v32 = vpop.permute.xlu1 %456 }
 0x2b1   : > { %v461_v35 = vsel %vm460_vm8, %v455_v58, %v457_v32  ;;  %v462_v36 = vsel %vm460_vm8, %v457_v32, %v1028_v55 }
 0x2b2   : > { %v465_v37 = vsel %vm1044_vm4, %v450_v33, %v461_v35  ;;  %v466_v38 = vsel %vm1036_vm2, %v451_v34, %v462_v36  ;;  %v467_v39 = vsel %vm1048_vm5, %v461_v35, %v450_v33  ;;  %v468_v40 = vsel %vm1040_vm3, %v462_v36, %v451_v34  ;;  %v556_v50 = vld [vmem:[#allocation3 + $0x20] sm:$0xff] }
 0x2b3   : > { %v471_v41 = vrot.slane %v465_v37, 4  ;;  %v472_v42 = vrot.slane %v466_v38, 4  ;;  %v492_v43 = vrot.slane %v467_v39, 4  ;;  %v493_v44 = vrot.slane %v468_v40, 4 }
 0x2b4   : > { %v558_v45 = vld [vmem:[#allocation3 + $0x38] sm:$0xf]  ;;  %v557_v47 = vld [vmem:[#allocation3 + $0x40] sm:$0xf]  ;;  %v534_v48 = vpop.permute.xlu1 %533 }
 0x2b5   : > { %770 = vmatprep.subr.msk.mxu1 %vm231_vm0, %v558_v45  ;;  %475 = vst [vmem:[#allocation3 + $0x18] sm:$0xf0] %v471_v41  ;;  %476 = vst [vmem:[#allocation3 + $0x10] sm:$0xf0] %v472_v42  ;;  %v540_v49 = vsel %vm539_vm11, %v534_v48, %v1032_v4 }
 0x2b6   : > { %496 = vst [vmem:[#allocation3 + $0x48] sm:$0xf0] %v492_v43  ;;  %497 = vst [vmem:[#allocation3 + $0x28] sm:$0xf0] %v493_v44  ;;  %771 = vmatpush1.msk.msra.mxu1 %vm231_vm0, %v557_v47 }
 0x2b7   : > { %544 = vst [vmem:[#allocation3 + $0x8] sm:$0xf0] %v540_v49  ;;  %592 = vmatprep.subr.mxu1 %v556_v50 }
 0x2b8   : > { %v404_v51 = vpop.permute.xlu1 %403 }
 0x2b9   : > { %v410_v52 = vsel %vm409_vm14, %v404_v51, %v406_v16 }
 0x2ba   : > { %v415_v53 = vsel %vm1044_vm4, %v410_v52, %v1010_v46  ;;  %v417_v54 = vsel %vm1048_vm5, %v1010_v46, %v410_v52  ;;  %v548_v46 = vld [vmem:[%s1138_s2] sm:$0xf] }
 0x2bb   : > { %419 = vst [vmem:[#allocation3 + $0x30] sm:$0xf] %v415_v53  ;;  %436 = vst [vmem:[#allocation3 + $0x18] sm:$0xf] %v417_v54 }
 0x2bc   : > { %v428_v55 = vpop.permute.xlu1 %427  ;;  %v552_v60 = vld [vmem:[#allocation3 + $0x10] sm:$0xff] }
 0x2bd   : > { %v431_v56 = vsel %vm429_vm6, %v1030_v3, %v428_v55  ;;  %v554_v58 = vld [vmem:[#allocation3 + $0x28] sm:$0xff] }
 0x2be   : > { %v555_v57 = vld [vmem:[#allocation3 + $0x8] sm:$0xff]  ;;  %435 = vst [vmem:[#allocation3] sm:$0xf0] %v431_v56 }
 0x2bf   : > { %593 = vmatpush1.msra.mxu1 %v555_v57  ;;  %v553_v59 = vld [vmem:[#allocation3 + $0x48] sm:$0xff] }
 0x2c0   : > { %594 = vmatprep.subr.mxu1 %v554_v58 }
 0x2c1   : > { %595 = vmatpush1.msra.mxu1 %v553_v59 }
 0x2c2   : > { %596 = vmatprep.subr.mxu1 %v552_v60  ;;  %v551_v61 = vld [vmem:[#allocation3 + $0x18] sm:$0xff]  ;;  %v549_v63 = vld [vmem:[#allocation3 + $0x30] sm:$0xff] }
 0x2c3   : > { %597 = vmatpush1.msra.mxu1 %v551_v61 }
 0x2c5   : > { %v550_v62 = vld [vmem:[#allocation3] sm:$0xff] }
 0x2c6   : > { %598 = vmatprep.subr.mxu1 %v550_v62 }
 0x2c7   : > { %599 = vmatpush1.msra.mxu1 %v549_v63 }
 0x2c8   : > { %772 = vmatmul.mubr.msk.f32.vlgmr.msra.gmra.mxu1 %vm227_vm1, %v548_v46 }
 0x388   : > { %v634_v0 = vpop.f32.mrf.mxu1 }
 0x389   : > { %v645_v1 = vmul.f32 %v634_v0, %v634_v0  ;;  %v639_v5 = vsel %vm231_vm0, %v634_v0, 0.0 }
 0x38a   : > { %v636_v2 = vpop.f32.mrf.mxu1 }
 0x38b   : > { %v640_v3 = vsel %vm231_vm0, %v636_v2, 0.0  ;;  %v646_v4 = vmul.f32 %v636_v2, %v636_v2  ;;  %v647_v7 = vsel %vm231_vm0, %v645_v1, 0.0 }
 0x38c   : > { %v641_v6 = vadd.f32 %v640_v3, %v639_v5 }
 0x38d   : > { %v648_v8 = vsel %vm231_vm0, %v646_v4, 0.0 }
 0x38e   : > { %642 = vadd.xlane.f32.xlu1 %v641_v6  ;;  %v649_v9 = vadd.f32 %v648_v8, %v647_v7 }
 0x390   : > { %650 = vadd.xlane.f32.xlu0 %v649_v9 }
 0x417   : > { %v643_v10 = vpop.xlane.xlu1 %642 }
 0x418   : > { %v644_v11 = vmul.f32 0.00390625, %v643_v10 }
 0x419   : > { %v651_v12 = vpop.xlane.xlu0 %650 }
 0x41a   : > { %v652_v13 = vmul.f32 0.00390625, %v651_v12  ;;  %v653_v14 = vmul.f32 %v644_v11, %v644_v11  ;;  %v656_v19 = vsub.f32 %v634_v0, %v644_v11  ;;  %v657_v20 = vsub.f32 %v636_v2, %v644_v11 }
 0x41c   : > { %v654_v15 = vsub.f32 %v652_v13, %v653_v14 }
 0x41e   : > { %v655_v16 = vmax.f32 %v654_v15, 0.0 }
 0x420   : > { %v658_v17 = vadd.f32 1e-05, %v655_v16 }
 0x422   : > { %840 = vrsqrt.f32 %v658_v17 }
 0x42f   : > { %v841_v22 = vpop.eup %840 }
 0x430   : > { %v660_v23 = vmul.f32 %v841_v22, %v656_v19  ;;  %v661_v24 = vmul.f32 %v841_v22, %v657_v20 }
 0x432   : > { %v666_v25 = vadd.f32 %v662_v18, %v660_v23  ;;  %v667_v26 = vadd.f32 %v664_v21, %v661_v24 }
 0x434   : > { %v670_v27 = vcombine.low %v666_v25, %v667_v26 }
 0x436   : > { %672 = vst [vmem:[%s205_s13] sm:$0xff] %v670_v27 }
 0x437   : > { %855 = shalt.err (!%p852_p3)
}
 0x438   : > { %s856_s5 = scalar_lea.hbm %s686_s22, 128  ;;  %s860_s8 = scalar_lea.hbm %s1140_s4, 256 }
 0x439   : > { %p857_p4 = scmp.ne.s32.totalorder %s686_s22, %s856_s5  ;;  %p861_p9 = scmp.lt.s32.totalorder %s686_s22, %s1140_s4 }
 0x43a   : > { %p862_p10 = scmp.lt.s32.totalorder %s860_s8, %s856_s5 }
 0x43b   : > { %p858_p7 = pnand %p857_p4, %p981_p5 }
 0x43c   : > { %p863_p11 = por %p862_p10, %p861_p9 }
 0x43d   : > { %p859_p8 = pneg %p858_p7 }
 0x43f   : > { %p864_p12 = pnand %p863_p11, %p859_p8 }
 0x441   : > { %867 = shalt.err (!%p864_p12)
}
 0x442   : > { %781 = dma.vmem_to_hbm [thread:$0]  (%p981_p5), %s689_s14, 128, %s686_s22, %s674_s23  }
 0x443 PF: > { %p787_p13 = scmp.ge.s32.totalorder %s902_s18, 2  ;;  %s700_s11 = sand.u32 1, %s890_s15  }
 0x444   : > { %s701_s12 = scalar_lea.sflag [#allocation5], %s700_s11 }
 0x445   : > { %p784_p0 = pnand %p787_p13, %p985_p6 }
 0x447   : > { %p785_p1 = pneg %p784_p0 }
 0x449   : > { %885 = dma.done.wait (%p785_p1), %s701_s12, 128  }
 0x44a   : > { %887 = vsyncadd (%p785_p1), %s701_s12, 4294967168  ;;  %p14_p2 = scmp.ge.s32.totalorder %s968_s21, 4   ;;  %s1151_s15 = smov %s894_s16 }
 0x44b   : > { %s1152_s16 = smov %s898_s17  ;;  %s1153_s17 = smov %s979_s24 }
 0x44c   : > { %s1154_s18 = smov %s968_s21  ;;  %16 = sbr.rel (!%p14_p2) target bundleno = 3 (0x3), region = 74 }
 0x451   :  { %706 = vsyncpa [#allocation5], 1 }
 0x452   :  { %708 = vsyncpa [#allocation5 + $0x1], 1 }

</bundles_post_ra>
